<compile_context>
chip_gen: v7x
topology: tpu7x:2x2x1
jax: 0.10.0
libtpu: 0.0.40
codegen_flags: <defaults>
</compile_context>

<pallas_src>
import functools

import jax
import jax.numpy as jnp
from jax.experimental import pallas as pl
from jax.experimental.pallas import tpu as pltpu

_LANE = 128


def _round_up(x, m):
    return ((x + m - 1) // m) * m


def _pad2d(a, shape):
    pads = tuple((0, t - s) for s, t in zip(a.shape, shape))
    if any(p[1] for p in pads):
        a = jnp.pad(a, pads)
    return a


def _vmem_capacity_bytes():
    try:
        return int(pltpu.get_tpu_info().vmem_capacity_bytes)
    except Exception:
        return 64 << 20  # v7x-safe fallback


def mlp2_kernel(x_ref, w1_ref, b1_ref, w2_ref, b2_ref, o_ref, acc_ref,
                *, compute_dtype):
    j = pl.program_id(1)

    @pl.when(j == 0)
    def _():
        acc_ref[...] = jnp.zeros_like(acc_ref)

    # Cast x to the matmul operand dtype on the VPU (hidden under the MXU).
    x = x_ref[...].astype(compute_dtype)
    # layer1 on this H-chunk, f32 accumulation on the MXU.
    h = jnp.dot(x, w1_ref[...], preferred_element_type=jnp.float32)
    # bias + ReLU stay f32 on the VPU (zero-padded chunks stay exactly zero).
    h = jnp.maximum(h + b1_ref[...], 0.0)
    # layer2 partial product for this chunk, accumulated into f32 VMEM scratch.
    acc_ref[...] += jnp.dot(h.astype(compute_dtype), w2_ref[...],
                            preferred_element_type=jnp.float32)

    @pl.when(j == pl.num_programs(1) - 1)
    def _():
        o_ref[...] = (acc_ref[...] + b2_ref[...]).astype(o_ref.dtype)


def _vmem_estimate(block_b, tile_h, d_in, d_out, x_bytes, w_bytes, out_bytes):
    x_tiles = 2 * block_b * d_in * x_bytes                       # x tile (2-deep)
    w_tiles = 2 * (d_in * tile_h + tile_h * d_out) * w_bytes     # W1/W2 chunks
    bias = 2 * (tile_h + d_out) * 4                              # b1 chunk + b2
    out_tiles = 2 * block_b * d_out * out_bytes                  # out tile
    acc = block_b * d_out * 4                                    # f32 accumulator
    interm = block_b * tile_h * (4 + w_bytes)                    # f32 h + cast temp
    return x_tiles + w_tiles + bias + out_tiles + acc + interm


def mlp2_forward(x, w1, b1, w2, b2, *, block_b=None, tile_h=None,
                 compute_dtype=None):
    """out = relu(x @ w1 + b1) @ w2 + b2   (MLP2 forward).

    x: [B, D_in]; w1: [D_in, H]; b1: [H]; w2: [H, D_out]; b2: [D_out]
    (weights stored transposed vs. torch.nn.Linear, i.e. y = x @ W + b).
    compute_dtype: matmul operand dtype (bf16 is fine on v5e/v6e/v7x — the MXU
    is bf16-native); accumulation, bias add and ReLU are always f32.
    """
    out_dtype = x.dtype
    compute_dtype = jnp.dtype(x.dtype if compute_dtype is None else compute_dtype)

    B, D_in = x.shape
    H = w1.shape[1]
    D_out = w2.shape[1]

    x_bytes = jnp.dtype(x.dtype).itemsize
    w_bytes = compute_dtype.itemsize
    out_bytes = jnp.dtype(out_dtype).itemsize
    sub = 16 if x_bytes == 2 else 8

    # Lane-dense padding targets (exact: zero rows/cols contribute nothing,
    # and relu(0 + 0) = 0).
    D_in_p = _round_up(D_in, _LANE)
    H_p0 = _round_up(H, _LANE)
    D_out_p = _round_up(D_out, _LANE)

    # Generation-aware VMEM budget (v5e/v6e: 128 MiB, v7x: 64 MiB per TC).
    capacity = _vmem_capacity_bytes()
    budget = int(capacity * 0.7)

    # ---- choose batch tile and H chunk ----------------------------------
    if block_b is None:
        row_target = 1024 if capacity >= (96 << 20) else 512
        # Aim for >= 8 grid steps over the batch (pipeline fill, 2-TC sharding).
        block_b = min(row_target, _round_up(max(1, pl.cdiv(B, 8)), sub))
    block_b = max(sub, _round_up(block_b, sub))

    if tile_h is None:
        tile_h = min(H_p0, 512)
    tile_h = min(max(_LANE, _round_up(tile_h, _LANE)), H_p0)

    # Shrink the H chunk first (it streams), then the batch tile, until the
    # double-buffered working set fits the budget.
    while (tile_h > _LANE and
           _vmem_estimate(block_b, tile_h, D_in_p, D_out_p,
                          x_bytes, w_bytes, out_bytes) > budget):
        tile_h = max(_LANE, _round_up(tile_h // 2, _LANE))
    while (block_b > sub and
           _vmem_estimate(block_b, tile_h, D_in_p, D_out_p,
                          x_bytes, w_bytes, out_bytes) > budget):
        block_b = max(sub, _round_up(block_b // 2, sub))

    # Rebalance tiles so padding is minimal and the batch grid is even
    # (balanced across v7x's two TensorCores).
    n_h = pl.cdiv(H_p0, tile_h)
    tile_h = _round_up(pl.cdiv(H_p0, n_h), _LANE)
    H_p = n_h * tile_h

    n_b = pl.cdiv(B, block_b)
    if n_b > 1 and n_b % 2:
        n_b += 1
    block_b = min(block_b, _round_up(pl.cdiv(B, n_b), sub))
    B_p = n_b * block_b

    # Host-side padding (skipped entirely when shapes are already aligned);
    # x keeps its native dtype and is cast inside the kernel.
    x_p = _pad2d(x, (B_p, D_in_p))
    w1_p = _pad2d(w1, (D_in_p, H_p)).astype(compute_dtype)
    w2_p = _pad2d(w2, (H_p, D_out_p)).astype(compute_dtype)
    b1_p = _pad2d(b1.astype(jnp.float32).reshape(1, H), (1, H_p))
    b2_p = _pad2d(b2.astype(jnp.float32).reshape(1, D_out), (1, D_out_p))

    cost = pl.CostEstimate(
        flops=2 * B_p * D_in_p * H_p + 2 * B_p * H_p * D_out_p,
        transcendentals=0,
        bytes_accessed=(B_p * D_in_p * x_bytes
                        + n_b * (D_in_p * H_p + H_p * D_out_p) * w_bytes
                        + n_b * (H_p + D_out_p) * 4
                        + B_p * D_out_p * out_bytes),
    )

    est = _vmem_estimate(block_b, tile_h, D_in_p, D_out_p,
                         x_bytes, w_bytes, out_bytes)
    vmem_limit = int(min(int(capacity * 0.9), max(est + (16 << 20), 32 << 20)))

    kernel = functools.partial(mlp2_kernel, compute_dtype=compute_dtype)

    out_p = pl.pallas_call(
        kernel,
        out_shape=jax.ShapeDtypeStruct((B_p, D_out_p), out_dtype),
        grid_spec=pltpu.PrefetchScalarGridSpec(
            num_scalar_prefetch=0,
            grid=(n_b, n_h),
            in_specs=[
                pl.BlockSpec((block_b, D_in_p), lambda i, j: (i, 0)),  # x tile
                pl.BlockSpec((D_in_p, tile_h), lambda i, j: (0, j)),   # W1 chunk
                pl.BlockSpec((1, tile_h), lambda i, j: (0, j)),        # b1 chunk
                pl.BlockSpec((tile_h, D_out_p), lambda i, j: (j, 0)),  # W2 chunk
                pl.BlockSpec((1, D_out_p), lambda i, j: (0, 0)),       # b2
            ],
            out_specs=pl.BlockSpec((block_b, D_out_p), lambda i, j: (i, 0)),
            scratch_shapes=[pltpu.VMEM((block_b, D_out_p), jnp.float32)],
        ),
        compiler_params=pltpu.CompilerParams(
            dimension_semantics=("parallel", "arbitrary"),
            vmem_limit_bytes=vmem_limit,
        ),
        cost_estimate=cost,
    )(x_p, w1_p, b1_p, w2_p, b2_p)

    if B_p == B and D_out_p == D_out:
        return out_p
    return out_p[:B, :D_out]


def init_params(key, input_size, hidden_size, output_size, dtype=jnp.float32):
    """Deterministic init matching torch.nn.Linear's U(-1/sqrt(fan_in), ...)."""
    k1, k2, k3, k4 = jax.random.split(key, 4)
    bound1 = 1.0 / jnp.sqrt(jnp.array(input_size, dtype=jnp.float32))
    bound2 = 1.0 / jnp.sqrt(jnp.array(hidden_size, dtype=jnp.float32))
    w1 = jax.random.uniform(k1, (input_size, hidden_size), dtype, -bound1, bound1)
    b1 = jax.random.uniform(k2, (hidden_size,), dtype, -bound1, bound1)
    w2 = jax.random.uniform(k3, (hidden_size, output_size), dtype, -bound2, bound2)
    b2 = jax.random.uniform(k4, (output_size,), dtype, -bound2, bound2)
    return w1, b1, w2, b2


if __name__ == "__main__":
    # TODO(synk): MLP2 takes a generic `activation` class; ReLU is implemented
    # here (other elementwise activations would be a one-line kernel change).
    key = jax.random.PRNGKey(0)
    kx, kp, kx2, kp2 = jax.random.split(key, 4)

    # 1) Small shapes consistent with MLP2: batch=16, input=32, hidden=64, output=16.
    B, D_in, H, D_out = 16, 32, 64, 16
    x = jax.random.normal(kx, (B, D_in), jnp.float32)
    w1, b1, w2, b2 = init_params(kp, D_in, H, D_out)
    ref = jnp.maximum(x @ w1 + b1, 0.0) @ w2 + b2

    out_f32 = jax.block_until_ready(mlp2_forward(x, w1, b1, w2, b2))
    assert out_f32.shape == (B, D_out)
    assert jnp.allclose(out_f32, ref, atol=1e-5, rtol=1e-5)

    # bf16 matmul operands (valid on v5e/v6e/v7x), f32 accumulate/bias/ReLU.
    out_bf16 = jax.block_until_ready(
        mlp2_forward(x, w1, b1, w2, b2, compute_dtype=jnp.bfloat16))
    assert out_bf16.shape == (B, D_out)
    assert jnp.allclose(out_bf16, ref, atol=5e-2, rtol=5e-2)

    # 2) Exercise the H-tiled accumulation path (grid=(8, 3)) with small,
    #    non-lane-aligned shapes.
    B2, D_in2, H2, D_out2 = 64, 96, 320, 48
    x2 = jax.random.normal(kx2, (B2, D_in2), jnp.float32)
    w1b, b1b, w2b, b2b = init_params(kp2, D_in2, H2, D_out2)
    ref2 = jnp.maximum(x2 @ w1b + b1b, 0.0) @ w2b + b2b
    out2 = jax.block_until_ready(
        mlp2_forward(x2, w1b, b1b, w2b, b2b, tile_h=128))
    assert out2.shape == (B2, D_out2)
    assert jnp.allclose(out2, ref2, atol=5e-4, rtol=5e-4)

    print("KERNEL_OK")
</pallas_src>

<mosaic_0001>
module attributes {stable_mosaic.version = 11 : i64} {
  func.func @mlp2_kernel(%arg0: i32, %arg1: i32, %arg2: memref<8x128xf32, #tpu.memory_space<vmem>>, %arg3: memref<128x128xf32, #tpu.memory_space<vmem>>, %arg4: memref<1x128xf32, #tpu.memory_space<vmem>>, %arg5: memref<128x128xf32, #tpu.memory_space<vmem>>, %arg6: memref<1x128xf32, #tpu.memory_space<vmem>>, %arg7: memref<8x128xf32, #tpu.memory_space<vmem>>, %arg8: memref<8x128xf32, #tpu.memory_space<vmem>>) attributes {dimension_semantics = [#tpu.dimension_semantics<parallel>, #tpu.dimension_semantics<arbitrary>], iteration_bounds = array<i64: 2, 1>, scalar_prefetch = 0 : i64, scratch_operands = 1 : i64, tpu.core_type = #tpu.core_type<tc>, window_params = [{transform_indices = @transform_0, window_bounds = array<i64: 8, 128>}, {transform_indices = @transform_1, window_bounds = array<i64: 128, 128>}, {transform_indices = @transform_2, window_bounds = array<i64: 1, 128>}, {transform_indices = @transform_3, window_bounds = array<i64: 128, 128>}, {pipeline_mode = #tpu.pipeline_mode<synchronous>, transform_indices = @transform_4, window_bounds = array<i64: 1, 128>}, {transform_indices = @transform_5, window_bounds = array<i64: 8, 128>}]} {
    %c0_i32 = arith.constant 0 : i32
    %0 = arith.cmpi eq, %arg1, %c0_i32 : i32
    %1 = arith.extui %0 : i1 to i32
    %c0_i32_0 = arith.constant 0 : i32
    %2 = arith.cmpi ne, %1, %c0_i32_0 : i32
    scf.if %2 {
      %cst_16 = arith.constant 0.000000e+00 : f32
      %19 = vector.broadcast %cst_16 : f32 to vector<8x128xf32>
      %c0_17 = arith.constant 0 : index
      %c0_18 = arith.constant 0 : index
      %20 = vector.load %arg8[%c0_17, %c0_18] : memref<8x128xf32, #tpu.memory_space<vmem>>, vector<8x128xf32>
      tpu.vector_store %arg8[%c0_17, %c0_18], %19 {strides = array<i32>} : memref<8x128xf32, #tpu.memory_space<vmem>>, vector<8x128xf32>,
    } else {
    }
    %c0 = arith.constant 0 : index
    %c0_1 = arith.constant 0 : index
    %3 = vector.load %arg2[%c0, %c0_1] : memref<8x128xf32, #tpu.memory_space<vmem>>, vector<8x128xf32>
    %c0_2 = arith.constant 0 : index
    %c0_3 = arith.constant 0 : index
    %4 = vector.load %arg3[%c0_2, %c0_3] : memref<128x128xf32, #tpu.memory_space<vmem>>, vector<128x128xf32>
    %cst = arith.constant dense<0.000000e+00> : vector<8x128xf32>
    %5 = tpu.matmul %3, %4, %cst {dimension_numbers = #tpu.dot_dimension_numbers<[1], [0], [0], [1], [0, 0, 1, 1], [], []>} : vector<8x128xf32>, vector<128x128xf32>, vector<8x128xf32> -> vector<8x128xf32>
    %c0_4 = arith.constant 0 : index
    %c0_5 = arith.constant 0 : index
    %6 = vector.load %arg4[%c0_4, %c0_5] : memref<1x128xf32, #tpu.memory_space<vmem>>, vector<1x128xf32>
    %7 = vector.broadcast %6 : vector<1x128xf32> to vector<8x128xf32>
    %8 = arith.addf %5, %7 : vector<8x128xf32>
    %cst_6 = arith.constant 0.000000e+00 : f32
    %9 = vector.broadcast %cst_6 : f32 to vector<8x128xf32>
    %10 = arith.maximumf %8, %9 : vector<8x128xf32>
    %c0_7 = arith.constant 0 : index
    %c0_8 = arith.constant 0 : index
    %11 = vector.load %arg8[%c0_7, %c0_8] : memref<8x128xf32, #tpu.memory_space<vmem>>, vector<8x128xf32>
    %c0_9 = arith.constant 0 : index
    %c0_10 = arith.constant 0 : index
    %12 = vector.load %arg5[%c0_9, %c0_10] : memref<128x128xf32, #tpu.memory_space<vmem>>, vector<128x128xf32>
    %cst_11 = arith.constant dense<0.000000e+00> : vector<8x128xf32>
    %13 = tpu.matmul %10, %12, %cst_11 {dimension_numbers = #tpu.dot_dimension_numbers<[1], [0], [0], [1], [0, 0, 1, 1], [], []>} : vector<8x128xf32>, vector<128x128xf32>, vector<8x128xf32> -> vector<8x128xf32>
    %14 = arith.addf %11, %13 : vector<8x128xf32>
    %c0_12 = arith.constant 0 : index
    %c0_13 = arith.constant 0 : index
    %15 = vector.load %arg8[%c0_12, %c0_13] : memref<8x128xf32, #tpu.memory_space<vmem>>, vector<8x128xf32>
    tpu.vector_store %arg8[%c0_12, %c0_13], %14 {strides = array<i32>} : memref<8x128xf32, #tpu.memory_space<vmem>>, vector<8x128xf32>,
    %c0_i32_14 = arith.constant 0 : i32
    %16 = arith.cmpi eq, %arg1, %c0_i32_14 : i32
    %17 = arith.extui %16 : i1 to i32
    %c0_i32_15 = arith.constant 0 : i32
    %18 = arith.cmpi ne, %17, %c0_i32_15 : i32
    scf.if %18 {
      %c0_16 = arith.constant 0 : index
      %c0_17 = arith.constant 0 : index
      %19 = vector.load %arg8[%c0_16, %c0_17] : memref<8x128xf32, #tpu.memory_space<vmem>>, vector<8x128xf32>
      %c0_18 = arith.constant 0 : index
      %c0_19 = arith.constant 0 : index
      %20 = vector.load %arg6[%c0_18, %c0_19] : memref<1x128xf32, #tpu.memory_space<vmem>>, vector<1x128xf32>
      %21 = vector.broadcast %20 : vector<1x128xf32> to vector<8x128xf32>
      %22 = arith.addf %19, %21 : vector<8x128xf32>
      %c0_20 = arith.constant 0 : index
      %c0_21 = arith.constant 0 : index
      %23 = vector.load %arg7[%c0_20, %c0_21] : memref<8x128xf32, #tpu.memory_space<vmem>>, vector<8x128xf32>
      tpu.vector_store %arg7[%c0_20, %c0_21], %22 {strides = array<i32>} : memref<8x128xf32, #tpu.memory_space<vmem>>, vector<8x128xf32>,
    } else {
    }
    return
  }
  func.func @transform_0(%arg0: i32, %arg1: i32) -> (i32, i32) {
    %c0_i32 = arith.constant 0 : i32
    %c0_i32_0 = arith.constant 0 : i32
    return %arg0, %c0_i32 : i32, i32
  }
  func.func @transform_1(%arg0: i32, %arg1: i32) -> (i32, i32) {
    %c0_i32 = arith.constant 0 : i32
    %c0_i32_0 = arith.constant 0 : i32
    return %c0_i32, %arg1 : i32, i32
  }
  func.func @transform_2(%arg0: i32, %arg1: i32) -> (i32, i32) {
    %c0_i32 = arith.constant 0 : i32
    %c0_i32_0 = arith.constant 0 : i32
    return %c0_i32, %arg1 : i32, i32
  }
  func.func @transform_3(%arg0: i32, %arg1: i32) -> (i32, i32) {
    %c0_i32 = arith.constant 0 : i32
    %c0_i32_0 = arith.constant 0 : i32
    return %arg1, %c0_i32 : i32, i32
  }
  func.func @transform_4(%arg0: i32, %arg1: i32) -> (i32, i32) {
    %c0_i32 = arith.constant 0 : i32
    %c0_i32_0 = arith.constant 0 : i32
    %c0_i32_1 = arith.constant 0 : i32
    return %c0_i32, %c0_i32_0 : i32, i32
  }
  func.func @transform_5(%arg0: i32, %arg1: i32) -> (i32, i32) {
    %c0_i32 = arith.constant 0 : i32
    %c0_i32_0 = arith.constant 0 : i32
    return %arg0, %c0_i32 : i32, i32
  }
}

</mosaic_0001>

<bundles_post_ra>
// kernel: tpu_custom_call.1
= control target key start
LH: loop header
LB: loop body
LE: loop exit
PB: predicated region body
PF: predicated region fallthrough
CT: control target
= control target key end

     0   :  { %10 = vsyncpa [#allocation4], 0  ;;  %s1392_s0 = inlined_call_operand.hbm [shape: f32[16,128], index: 0, kind: input, shape index: {}]   ;;  %s1393_s1 = inlined_call_operand.hbm [shape: f32[128,128], index: 1, kind: input, shape index: {}]   ;;  %s1394_s2 = inlined_call_operand.vmem [shape: f32[1,128], index: 2, kind: input, shape index: {}]   ;;  %s1395_s3 = inlined_call_operand.hbm [shape: f32[128,128], index: 3, kind: input, shape index: {}]   ;;  %s1396_s4 = inlined_call_operand.vmem [shape: f32[1,128], index: 4, kind: input, shape index: {}]   ;;  %s1397_s5 = inlined_call_operand.hbm [shape: f32[16,128], index: 5, kind: output, shape index: {}]  }
   0x1   :  { %12 = vsyncpa [#allocation4 + $0x1], 0 }
   0x2   :  { %13 = vsyncpa [#allocation7], 0 }
   0x3   :  { %14 = vsyncpa [#allocation5], 0 }
   0x4   :  { %16 = vsyncpa [#allocation5 + $0x1], 0  ;;  %s1113_s18 = smov 0   ;;  %s1115_s19 = smov 0  }
   0x5   :  { %s1117_s20 = smov 0   ;;  %s1119_s21 = smov 0  }
   0x6   :  { %s1121_s22 = smov 0   ;;  %s1123_s23 = smov 0  }
   0x7 LB: > { %s640_s24 = sadd.s32 4294967295, %s1072_s23   ;;  %s641_s25 = sadd.s32 4294967294, %s1072_s23   ;;  %s1072_s23 = sphi %s1123_s23, %s22_s23   ;;  %s1068_s22 = sphi %s1121_s22, %s1419_s22   ;;  %s1064_s21 = sphi %s1119_s21, %s1418_s21   ;;  %s1060_s20 = sphi %s1117_s20, %s1417_s20   ;;  %s1056_s19 = sphi %s1115_s19, %s1416_s19   ;;  %s1052_s18 = sphi %s1113_s18, %s1415_s18  }
   0x8   : > { %p54_p0 = scmp.ne.s32.totalorder %s1056_s19, %s1052_s18  ;;  %p1147_p1 = scmp.eq.s32.totalorder %s640_s24, 0 }
   0x9   : > { %p1151_p2 = scmp.eq.s32.totalorder %s640_s24, 1  ;;  %p183_p3 = scmp.eq.s32.totalorder %s641_s25, 1 }
   0xa   : > { %s1402_s26 = scalar_select %p1147_p1, 1, 0 }
   0xb   : > { %p1157_p4 = por %p1147_p1, %p54_p0  ;;  %p642_p5 = scmp.ge.s32.totalorder %s1072_s23, 1 }
   0xc   : > { %p1162_p6 = por %p183_p3, %p54_p0  ;;  %p190_p7 = scmp.lt.s32.totalorder %s1072_s23, 3 }
   0xd   : > { %s1404_s28 = scalar_select %p1157_p4, 1, 0 }
   0xe   : > { %s1405_s29 = scalar_select %p1162_p6, 1, 0 }
   0xf   : > { %p1167_p8 = pnand %p642_p5, %p190_p7  ;;  %s1074_s6 = smov [#allocation6]  }
  0x10   : > { %s204_s7 = sshll.u32 %s1074_s6, 4  ;;  %s1075_s9 = smov [#allocation8]   ;;  %s1171_s7 = int_to_ptr.vmem [resolvable:$true] %s204_s7 }
  0x11   : > { %p824_p9 = pneg %p1167_p8  ;;  %s226_s10 = sshll.u32 %s1075_s9, 4  ;;  %s1182_s10 = int_to_ptr.vmem [resolvable:$true] %s226_s10 }
  0x12   : > { %s900_s13 = scalar_lea.hbm %s1393_s1, 2048 }
  0x13   : > { %p1178_p11 = pnand %p824_p9, %p1147_p1  ;;  %p901_p12 = scmp.ne.s32.totalorder %s1393_s1, %s900_s13 }
  0x14   : > { %p907_p5 = scmp.lt.u32.totalorder %s900_s13, %s1393_s1 }
  0x15   : > { %p902_p13 = pneg %p1178_p11 }
  0x17   : > { %p903_p0 = pnand %p902_p13, %p901_p12 }
  0x19   : > { %p904_p3 = pneg %p903_p0 }
  0x1b   : > { %p909_p7 = pnand %p907_p5, %p904_p3 }
  0x1d   : > { %912 = shalt.err (!%p909_p7)
}
  0x1e   : > { %s913_s24 = scalar_lea.vmem %s1171_s7, 2048  ;;  %p921_p1 = scmp.lt.s32.totalorder %s1171_s7, %s1171_s7 }
  0x1f   : > { %p914_p9 = scmp.ne.s32.totalorder %s1171_s7, %s913_s24  ;;  %p922_p12 = scmp.lt.s32.totalorder %s913_s24, %s913_s24 }
  0x21   : > { %p916_p10 = pnand %p914_p9, %p902_p13  ;;  %p923_p0 = por %p922_p12, %p921_p1 }
  0x23   : > { %p917_p6 = pneg %p916_p10 }
  0x25   : > { %p924_p4 = pnand %p923_p0, %p917_p6 }
  0x27   : > { %927 = shalt.err (!%p924_p4)
}
  0x28   : > { %s1076_s25 = smov 128   ;;  %s1077_s6 = smov 8  }
  0x29   : > { %827 = dma.hbm_to_vmem [thread:$0]  (!%p1178_p11), %s1393_s1, 2048, %s1171_s7, [#allocation7], %s1076_s25, %s1076_s25, %s1077_s6  }
  0x2a   : > { %s928_s14 = scalar_lea.hbm %s1395_s3, 2048 }
  0x2b   : > { %p929_p1 = scmp.ne.s32.totalorder %s1395_s3, %s928_s14  ;;  %p935_p10 = scmp.lt.u32.totalorder %s928_s14, %s1395_s3 }
  0x2d   : > { %p931_p4 = pnand %p929_p1, %p902_p13 }
  0x2f   : > { %p932_p6 = pneg %p931_p4 }
  0x31   : > { %p937_p3 = pnand %p935_p10, %p932_p6 }
  0x33   : > { %940 = shalt.err (!%p937_p3)
}
  0x34   : > { %s941_s7 = scalar_lea.vmem %s1182_s10, 2048  ;;  %p949_p12 = scmp.lt.s32.totalorder %s1182_s10, %s1182_s10 }
  0x35   : > { %p942_p5 = scmp.ne.s32.totalorder %s1182_s10, %s941_s7  ;;  %p950_p0 = scmp.lt.s32.totalorder %s941_s7, %s941_s7 }
  0x37   : > { %p944_p7 = pnand %p942_p5, %p902_p13  ;;  %p951_p1 = por %p950_p0, %p949_p12 }
  0x39   : > { %p945_p9 = pneg %p944_p7 }
  0x3b   : > { %p952_p4 = pnand %p951_p1, %p945_p9 }
  0x3d   : > { %955 = shalt.err (!%p952_p4)
}
  0x3e   : > { %830 = dma.hbm_to_vmem [thread:$0]  (!%p1178_p11), %s1395_s3, 2048, %s1182_s10, [#allocation7], %s1076_s25, %s1076_s25, %s1077_s6  }
  0x3f   : > { %s34_s12 = sadd.s32 1, %s1068_s22  ;;  %s41_s13 = sadd.s32 1, %s1060_s20 }
  0x40   : > { %p36_p13 = scmp.ge.s32.totalorder %s34_s12, 2  ;;  %p48_p6 = scmp.ne.s32.totalorder %s1060_s20, %s1056_s19 }
  0x41   : > { %p49_p10 = scmp.eq.s32.totalorder %s1072_s23, 0  ;;  %p841_p3 = scmp.lt.s32.totalorder %s1072_s23, 2 }
  0x42   : > { %s1421_s12 = smov (%p36_p13, %s34_s12), 0  ;;  %p1246_p7 = por %p1151_p2, %p48_p6 }
  0x43   : > { %p50_p5 = por %p49_p10, %p48_p6  ;;  %s38_s14 = ssub.s32 %s1068_s22, %s1421_s12 }
  0x44   : > { %s1408_s8 = scalar_select %p1246_p7, 1, 0 }
  0x45   : > { %s243_s15 = sand.u32 1, %s1060_s20   ;;  %p39_p9 = scmp.eq.s32.totalorder %s38_s14, 0 }
  0x46   : > { %s647_s10 = sshll.u32 %s243_s15, 3  ;;  %s648_s25 = sshll.u32 %s1068_s22, 7 }
  0x47   : > { %s1255_s6 = scalar_select %p39_p9, %s1060_s20, %s41_s13  }
  0x48   : > { %s1260_s24 = scalar_lea.hbm %s1392_s0, %s648_s25  ;;  %s247_s27 = scalar_lea.vmem [#allocation3], %s647_s10 }
  0x49   : > { %s254_s7 = sshll.u32 %s247_s27, 4  ;;  %p1264_p2 = pnand %p841_p3, %p50_p5  ;;  %s1268_s7 = int_to_ptr.vmem [resolvable:$true] %s254_s7 }
  0x4a   : > { %s244_s11 = scalar_lea.sflag [#allocation4], %s243_s15  ;;  %s956_s13 = scalar_lea.hbm %s1260_s24, 128 }
  0x4b   : > { %p957_p11 = scmp.ne.s32.totalorder %s1260_s24, %s956_s13  ;;  %p958_p12 = pneg %p1264_p2 }
  0x4c   : > { %s961_s25 = scalar_lea.hbm %s1392_s0, 256  ;;  %p962_p4 = scmp.lt.u32.totalorder %s1260_s24, %s1392_s0 }
  0x4d   : > { %p959_p0 = pnand %p958_p12, %p957_p11  ;;  %p963_p13 = scmp.lt.u32.totalorder %s961_s25, %s956_s13 }
  0x4e   : > { %p965_p10 = scmp.lt.u32.totalorder %s956_s13, %s1260_s24 }
  0x4f   : > { %p960_p1 = pneg %p959_p0  ;;  %p964_p6 = por %p963_p13, %p962_p4 }
  0x51   : > { %p966_p3 = por %p965_p10, %p964_p6 }
  0x53   : > { %p967_p5 = pnand %p966_p3, %p960_p1 }
  0x55   : > { %970 = shalt.err (!%p967_p5)
}
  0x56   : > { %s971_s15 = scalar_lea.vmem %s1268_s7, 128  ;;  %s1078_s27 = smov [#allocation3]  }
  0x57   : > { %p972_p9 = scmp.ne.s32.totalorder %s1268_s7, %s971_s15  ;;  %s976_s14 = sshll.u32 %s1078_s27, 4  ;;  %s977_s14 = int_to_ptr.vmem [resolvable:$false] %s976_s14 }
  0x58   : > { %s978_s10 = scalar_lea.vmem %s977_s14, 256  ;;  %p979_p7 = scmp.lt.s32.totalorder %s1268_s7, %s977_s14 }
  0x59   : > { %p974_p11 = pnand %p972_p9, %p958_p12  ;;  %p980_p4 = scmp.lt.s32.totalorder %s978_s10, %s971_s15 }
  0x5b   : > { %p975_p0 = pneg %p974_p11  ;;  %p981_p13 = por %p980_p4, %p979_p7 }
  0x5d   : > { %p982_p6 = pnand %p981_p13, %p975_p0 }
  0x5f   : > { %985 = shalt.err (!%p982_p6)
}
  0x60   : > { %834 = dma.hbm_to_vmem [thread:$0]  (!%p1264_p2), %s1260_s24, 128, %s1268_s7, %s244_s11  }
  0x61   : > { %263 = sbr.rel (%p1167_p8) target bundleno = 587 (0x24b), region = 40  ;;  %s1298_s13 = sand.u32 (!%p1167_p8), 1, %s1056_s19  }
  0x62   : > { %s650_s25 = sshll.u32 (!%p1167_p8), %s1298_s13, 3  ;;  %s266_s16 = scalar_lea.sflag (!%p1167_p8), [#allocation4], %s1298_s13 }
  0x63   : > { %s1304_s17 = scalar_lea.vmem (!%p1167_p8), [#allocation3], %s650_s25  ;;  %p1410_p7 = scmp.ne.s32.totalorder (!%p1167_p8), %s1404_s28, 0 }
  0x68   : > { %1039 = dma.done.wait (%p1410_p7), %s266_s16, 128  }
  0x69   : > { %1041 = vsyncadd (%p1410_p7), %s266_s16, 4294967168  ;;  %p1411_p2 = scmp.ne.s32.totalorder %s1402_s26, 0 }
  0x6b   : > { %1043 = dma.done.wait (%p1411_p2), [#allocation7], 4096  }
  0x6c   : > { %1045 = vsyncadd (%p1411_p2), [#allocation7], 4294963200  ;;  %v1079_v0 = vmov 0.0|0.0   ;;  %vm1080_vm0 = vmmov 0   ;;  %v1081_v1 = vmov 0.0   ;;  %v317_v2 = vld [vmem:[#allocation6] sm:$0xff] }
  0x6d   : > { %764 = vmatprep.subr.bf16.mxu0 %v1079_v0  ;;  %726 = vmatprep.mubr.msk.f32.mxu0 %vm1080_vm0, %v1081_v1  ;;  %v318_v3 = vld [vmem:[#allocation6 + $0x8] sm:$0xff]  ;;  %v319_v4 = vld [vmem:[#allocation6 + $0x10] sm:$0xff]  ;;  %v320_v6 = vld [vmem:[#allocation6 + $0x18] sm:$0xff]  ;;  %s657_s7 = sshll.u32 %s1064_s21, 7  ;;  %s306_s9 = scalar_lea.vmem [#allocation9], %s650_s25 }
  0x6e   : > { %788 = vmatprep.subr.bf16.mxu1 %v1079_v0  ;;  %761 = vmatprep.mubr.msk.f32.mxu1 %vm1080_vm0, %v1081_v1  ;;  %v765_v5 = vpack.c.bf16 %v318_v3, %v317_v2  ;;  %v768_v7 = vpack.c.bf16 %v320_v6, %v319_v4  ;;  %v321_v8 = vld [vmem:[#allocation6 + $0x20] sm:$0xff]  ;;  %v322_v9 = vld [vmem:[#allocation6 + $0x28] sm:$0xff]  ;;  %v414_v12 = vld [vmem:[#allocation8 + $0x10] sm:$0xff]  ;;  %s527_s11 = sshll.u32 %s306_s9, 4  ;;  %s1343_s14 = scalar_lea.hbm %s1397_s5, %s657_s7  ;;  %s1345_s11 = int_to_ptr.vmem [resolvable:$true] %s527_s11 }
  0x6f   : > { %v412_v10 = vld [vmem:[#allocation8] sm:$0xff]  ;;  %v413_v11 = vld [vmem:[#allocation8 + $0x8] sm:$0xff]  ;;  %v415_v13 = vld [vmem:[#allocation8 + $0x18] sm:$0xff]  ;;  %v771_v14 = vpack.c.bf16 %v322_v9, %v321_v8  ;;  %s514_s10 = scalar_lea.sflag [#allocation5], %s1298_s13  ;;  %s986_s16 = scalar_lea.vmem %s1345_s11, 128 }
  0x70   : > { %766 = vmatpush3.bf16.msra.mxu0 %v765_v5  ;;  %v789_v15 = vpack.c.bf16 %v413_v11, %v412_v10  ;;  %v323_v16 = vld [vmem:[#allocation6 + $0x30] sm:$0xff]  ;;  %v324_v17 = vld [vmem:[#allocation6 + $0x38] sm:$0xff]  ;;  %v792_v18 = vpack.c.bf16 %v415_v13, %v414_v12  ;;  %v416_v19 = vld [vmem:[#allocation8 + $0x20] sm:$0xff]  ;;  %p987_p8 = scmp.ne.s32.totalorder %s1345_s11, %s986_s16  ;;  %p1412_p12 = scmp.ne.s32.totalorder %s1408_s8, 0 }
  0x71   : > { %767 = vmatprep.subr.bf16.mxu0 %v1079_v0  ;;  %v417_v20 = vld [vmem:[#allocation8 + $0x28] sm:$0xff]  ;;  %v774_v21 = vpack.c.bf16 %v324_v17, %v323_v16  ;;  %v325_v22 = vld [vmem:[#allocation6 + $0x40] sm:$0xff]  ;;  %v418_v25 = vld [vmem:[#allocation8 + $0x30] sm:$0xff]  ;;  %s1082_s21 = smov [#allocation9]  }
  0x72   : > { %790 = vmatpush3.bf16.msra.mxu1 %v789_v15  ;;  %v326_v23 = vld [vmem:[#allocation6 + $0x48] sm:$0xff]  ;;  %v795_v24 = vpack.c.bf16 %v417_v20, %v416_v19  ;;  %v419_v26 = vld [vmem:[#allocation8 + $0x38] sm:$0xff]  ;;  %v327_v28 = vld [vmem:[#allocation6 + $0x50] sm:$0xff]  ;;  %p988_p1 = pnand %p987_p8, %p1412_p12  ;;  %s990_s25 = sshll.u32 %s1082_s21, 4  ;;  %s991_s25 = int_to_ptr.vmem [resolvable:$false] %s990_s25 }
  0x73   : > { %791 = vmatprep.subr.bf16.mxu1 %v1079_v0  ;;  %v777_v27 = vpack.c.bf16 %v326_v23, %v325_v22  ;;  %v328_v29 = vld [vmem:[#allocation6 + $0x58] sm:$0xff]  ;;  %v798_v30 = vpack.c.bf16 %v419_v26, %v418_v25  ;;  %v420_v31 = vld [vmem:[#allocation8 + $0x40] sm:$0xff]  ;;  %v421_v32 = vld [vmem:[#allocation8 + $0x48] sm:$0xff]  ;;  %p993_p3 = scmp.lt.s32.totalorder %s1345_s11, %s991_s25 }
  0x74   : > { %769 = vmatpush3.bf16.msra.mxu0 %v768_v7  ;;  %v780_v33 = vpack.c.bf16 %v328_v29, %v327_v28  ;;  %v329_v34 = vld [vmem:[#allocation6 + $0x60] sm:$0xff]  ;;  %v330_v35 = vld [vmem:[#allocation6 + $0x68] sm:$0xff]  ;;  %v801_v36 = vpack.c.bf16 %v421_v32, %v420_v31  ;;  %v422_v37 = vld [vmem:[#allocation8 + $0x50] sm:$0xff]  ;;  %p989_p10 = pneg %p988_p1 }
  0x75   : > { %770 = vmatprep.subr.bf16.mxu0 %v1079_v0  ;;  %v423_v38 = vld [vmem:[#allocation8 + $0x58] sm:$0xff]  ;;  %v783_v39 = vpack.c.bf16 %v330_v35, %v329_v34  ;;  %v331_v40 = vld [vmem:[#allocation6 + $0x70] sm:$0xff]  ;;  %v424_v43 = vld [vmem:[#allocation8 + $0x60] sm:$0xff] }
  0x76   : > { %793 = vmatpush3.bf16.msra.mxu1 %v792_v18  ;;  %v332_v41 = vld [vmem:[#allocation6 + $0x78] sm:$0xff]  ;;  %v804_v42 = vpack.c.bf16 %v423_v38, %v422_v37  ;;  %v425_v44 = vld [vmem:[#allocation8 + $0x68] sm:$0xff]  ;;  %v426_v48 = vld [vmem:[#allocation8 + $0x70] sm:$0xff] }
  0x77   : > { %794 = vmatprep.subr.bf16.mxu1 %v1079_v0  ;;  %v786_v45 = vpack.c.bf16 %v332_v41, %v331_v40  ;;  %v807_v46 = vpack.c.bf16 %v425_v44, %v424_v43  ;;  %v316_v47 = vld [vmem:[%s1304_s17] sm:$0xff]  ;;  %s992_s17 = scalar_lea.vmem %s991_s25, 256 }
  0x78   : > { %772 = vmatpush3.bf16.msra.mxu0 %v771_v14  ;;  %v427_v49 = vld [vmem:[#allocation8 + $0x78] sm:$0xff]  ;;  %v654_v51 = vld [vmem:[%s1394_s2] ss:$0 sm:$0xff]  ;;  %p994_p5 = scmp.lt.s32.totalorder %s992_s17, %s986_s16 }
  0x79   : > { %773 = vmatprep.subr.bf16.mxu0 %v1079_v0  ;;  %v810_v50 = vpack.c.bf16 %v427_v49, %v426_v48  ;;  %v655_v56 = vld [vmem:[%s1396_s4] ss:$0 sm:$0xff] }
  0x7a   : > { %796 = vmatpush3.bf16.msra.mxu1 %v795_v24  ;;  %p995_p9 = por %p994_p5, %p993_p3 }
  0x7b   : > { %797 = vmatprep.subr.bf16.mxu1 %v1079_v0 }
  0x7c   : > { %775 = vmatpush3.bf16.msra.mxu0 %v774_v21  ;;  %p996_p11 = pnand %p995_p9, %p989_p10 }
  0x7d   : > { %776 = vmatprep.subr.bf16.mxu0 %v1079_v0 }
  0x7e   : > { %799 = vmatpush3.bf16.msra.mxu1 %v798_v30 }
  0x7f   : > { %800 = vmatprep.subr.bf16.mxu1 %v1079_v0 }
  0x80   : > { %778 = vmatpush3.bf16.msra.mxu0 %v777_v27 }
  0x81   : > { %779 = vmatprep.subr.bf16.mxu0 %v1079_v0 }
  0x82   : > { %802 = vmatpush3.bf16.msra.mxu1 %v801_v36 }
  0x83   : > { %803 = vmatprep.subr.bf16.mxu1 %v1079_v0 }
  0x84   : > { %781 = vmatpush3.bf16.msra.mxu0 %v780_v33 }
  0x85   : > { %782 = vmatprep.subr.bf16.mxu0 %v1079_v0 }
  0x86   : > { %805 = vmatpush3.bf16.msra.mxu1 %v804_v42 }
  0x87   : > { %806 = vmatprep.subr.bf16.mxu1 %v1079_v0 }
  0x88   : > { %784 = vmatpush3.bf16.msra.mxu0 %v783_v39 }
  0x89   : > { %785 = vmatprep.subr.bf16.mxu0 %v1079_v0 }
  0x8a   : > { %808 = vmatpush3.bf16.msra.mxu1 %v807_v46 }
  0x8b   : > { %809 = vmatprep.subr.bf16.mxu1 %v1079_v0 }
  0x8c   : > { %787 = vmatpush3.bf16.msra.mxu0 %v786_v45 }
  0x8e   : > { %811 = vmatpush3.bf16.msra.mxu1 %v810_v50 }
  0x8f   : > { %727 = vmatmul.mubr.f32.vlgmr.msra.gmra.mrb[0].mxu0 %v316_v47 }
 0x162   : > { %v406_v52 = vpop.f32.mrb[0].mxu0 }
 0x163   : > { %v407_v53 = vadd.f32 %v654_v51, %v406_v52  ;;  %v728_v54 = vpop.f32.mrb[1].mxu0 }
 0x165   : > { %v410_v55 = vmax.f32 %v407_v53, 0.0 }
 0x167   : > { %762 = vmatmul.mubr.f32.vlgmr.msra.gmra.mrb[0].mxu1 %v410_v55 }
 0x23a   : > { %v494_v57 = vpop.f32.mrb[0].mxu1 }
 0x23b   : > { %v511_v58 = vadd.f32 %v655_v56, %v494_v57  ;;  %v763_v59 = vpop.f32.mrb[1].mxu1 }
 0x23d   : > { %512 = vst [vmem:[%s306_s9] sm:$0xff] %v511_v58 }
 0x23e   : > { %999 = shalt.err (!%p996_p11)
}
 0x23f   : > { %s1000_s13 = scalar_lea.hbm %s1343_s14, 128  ;;  %s1004_s30 = scalar_lea.hbm %s1397_s5, 256 }
 0x240   : > { %p1001_p0 = scmp.ne.s32.totalorder %s1343_s14, %s1000_s13  ;;  %p1005_p6 = scmp.lt.u32.totalorder %s1343_s14, %s1397_s5 }
 0x241   : > { %p1006_p7 = scmp.lt.u32.totalorder %s1004_s30, %s1000_s13  ;;  %p1008_p8 = scmp.lt.u32.totalorder %s1000_s13, %s1343_s14 }
 0x242   : > { %p1002_p4 = pnand %p1001_p0, %p1412_p12 }
 0x243   : > { %p1007_p2 = por %p1006_p7, %p1005_p6 }
 0x244   : > { %p1003_p13 = pneg %p1002_p4 }
 0x245   : > { %p1009_p1 = por %p1008_p8, %p1007_p2 }
 0x247   : > { %p1010_p10 = pnand %p1009_p1, %p1003_p13 }
 0x249   : > { %1013 = shalt.err (!%p1010_p10)
}
 0x24a   : > { %822 = dma.vmem_to_hbm [thread:$0]  (%p1412_p12), %s1345_s11, 128, %s1343_s14, %s514_s10  }
 0x24b PF: > { %s539_s9 = sand.u32 1, %s1052_s18   ;;  %p1413_p3 = scmp.ne.s32.totalorder %s1405_s29, 0 }
 0x24c   : > { %p1414_p5 = scmp.ge.s32.totalorder %s1072_s23, 2  ;;  %s540_s15 = scalar_lea.sflag [#allocation5], %s539_s9 }
 0x24e   : > { %p836_p9 = pnand %p1414_p5, %p1413_p3 }
 0x250   : > { %1047 = dma.done.wait (!%p836_p9), %s540_s15, 128  }
 0x251   : > { %1049 = vsyncadd (!%p836_p9), %s540_s15, 4294967168  ;;  %s22_s23 = sadd.s32 1, %s1072_s23   ;;  %s1415_s18 = smov %s1056_s19 }
 0x252   : > { %p19_p11 = scmp.ge.s32.totalorder %s22_s23, 4   ;;  %s1416_s19 = smov %s1060_s20 }
 0x253   : > { %s1417_s20 = smov %s1255_s6  ;;  %s1418_s21 = smov %s1068_s22 }
 0x254   : > { %s1419_s22 = smov %s1421_s12  ;;  %21 = sbr.rel (!%p19_p11) target bundleno = 7 (0x7), region = 106 }
 0x25b   :  { %545 = vsyncpa [#allocation4], 1 }
 0x25c   :  { %547 = vsyncpa [#allocation4 + $0x1], 1 }
 0x25d   :  { %548 = vsyncpa [#allocation7], 1 }
 0x25e   :  { %549 = vsyncpa [#allocation5], 1 }
 0x25f   :  { %551 = vsyncpa [#allocation5 + $0x1], 1 }

</bundles_post_ra>
